<compile_context>
chip_gen: v5e
topology: v5e:2x2
jax: 0.10.0
libtpu: 0.0.40
codegen_flags: <defaults>
</compile_context>

<pallas_src>
import math
import functools

import jax
import jax.numpy as jnp
from jax import lax
from jax.experimental import pallas as pl
from jax.experimental.pallas import tpu as pltpu


# ----------------------------- in-kernel helpers -----------------------------
def _layer_norm(x, gamma, beta, eps):
    mu = jnp.mean(x, axis=-1, keepdims=True)
    xc = x - mu
    var = jnp.mean(xc * xc, axis=-1, keepdims=True)
    return xc * lax.rsqrt(var + eps) * gamma + beta


def _gelu_new(x):
    c = math.sqrt(2.0 / math.pi)
    return 0.5 * x * (1.0 + jnp.tanh(c * (x + 0.044715 * x * x * x)))


# --------------------------------- kernel ------------------------------------
def _bert_layer_kernel(xq_ref, xkv_ref, mask_ref,
                       wq_ref, wk_ref, wv_ref, wo_ref, wi_ref, wd_ref,
                       vec_ref, out_ref,
                       *, num_heads, head_dim, hidden_size, kv_size,
                       inter_size, ln_eps):
    """BertLayer forward for one (batch element, query tile)."""
    f32 = jnp.float32
    bf16 = jnp.bfloat16
    H, H3, I = hidden_size, kv_size, inter_size

    xq = xq_ref[0]                         # (tq, H) bf16 : query rows
    xkv = xkv_ref[0]                       # (S,  H) bf16 : full sequence (K/V)
    mask = mask_ref[0]                     # (1,  S) f32 additive mask
    xq_f32 = xq.astype(f32)                # residual path in f32

    # Packed bias / LayerNorm vectors: one DMA, sliced in-VMEM.
    vecs = vec_ref[...]                    # (10, W) f32
    bq = vecs[0:1, :H]
    bk = vecs[1:2, :H3]
    bv = vecs[2:3, :H3]
    bo = vecs[3:4, :H]
    g1 = vecs[4:5, :H]
    b1 = vecs[5:6, :H]
    bi = vecs[6:7, :I]
    bd = vecs[7:8, :H]
    g2 = vecs[8:9, :H]
    b2 = vecs[9:10, :H]

    # ---- BertSelfAttention projections --------------------------------------
    q = (jnp.dot(xq, wq_ref[...], preferred_element_type=f32)
         + bq).astype(bf16)                                         # (tq, H)
    # K/V project to H/3 once; torch.cat([k,k,k], -1) is a lane replication.
    ks = jnp.dot(xkv, wk_ref[...], preferred_element_type=f32) + bk  # (S, H3)
    vs = jnp.dot(xkv, wv_ref[...], preferred_element_type=f32) + bv  # (S, H3)
    k = jnp.concatenate([ks, ks, ks], axis=-1).astype(bf16)          # (S, H)
    v = jnp.concatenate([vs, vs, vs], axis=-1).astype(bf16)          # (S, H)

    scale = 1.0 / math.sqrt(head_dim)
    ctx_parts = []
    for h in range(num_heads):             # static unroll (small NH here)
        lo, hi = h * head_dim, (h + 1) * head_dim
        # q_h @ k_h^T contracting last dims — no transposed copy of k.
        s = lax.dot_general(q[:, lo:hi], k[:, lo:hi],
                            (((1,), (1,)), ((), ())),
                            preferred_element_type=f32)              # (tq, S)
        s = s * scale + mask                # mask broadcasts over query rows
        m = jnp.max(s, axis=-1, keepdims=True)
        p = jnp.exp(s - m)
        denom = jnp.sum(p, axis=-1, keepdims=True)
        probs = p * pl.reciprocal(denom, approx=True)                # EUP slot
        ctx_parts.append(jnp.dot(probs.astype(bf16), v[:, lo:hi],
                                 preferred_element_type=f32))        # (tq, d)
    # Lane-dense context, then ONE K=H output-projection matmul.
    ctx = jnp.concatenate(ctx_parts, axis=-1).astype(bf16)           # (tq, H)

    # ---- BertSelfOutput: dense + residual + LayerNorm ------------------------
    attn = jnp.dot(ctx, wo_ref[...], preferred_element_type=f32) + bo
    x1 = _layer_norm(attn + xq_f32, g1, b1, ln_eps)                   # (tq, H)

    # ---- BertIntermediate: dense + GELU ('gelu_new') --------------------------
    inter = jnp.dot(x1.astype(bf16), wi_ref[...],
                    preferred_element_type=f32) + bi                  # (tq, I)
    inter = _gelu_new(inter)

    # ---- BertOutput: dense + residual + LayerNorm -----------------------------
    out = jnp.dot(inter.astype(bf16), wd_ref[...],
                  preferred_element_type=f32) + bd                    # (tq, H)
    y = _layer_norm(out + x1, g2, b2, ln_eps)

    out_ref[0] = y.astype(out_ref.dtype)            # lane-dense (tq, H) write


# ------------------------ one-time weight packing -----------------------------
def pack_bert_layer_params(p):
    """Hoisted out of the per-call path ("model load"): transposes, bf16 casts
    and packing of all bias / LayerNorm vectors into one f32 slab."""
    H = p["wq"].shape[0]
    H3 = p["wk"].shape[0]
    I = p["wi"].shape[0]
    W = max(H, I)
    bf16, f32 = jnp.bfloat16, jnp.float32

    def row(vec):
        vec = vec.astype(f32).reshape(1, -1)
        return jnp.pad(vec, ((0, 0), (0, W - vec.shape[1])))

    vec_slab = jnp.concatenate(
        [row(p["bq"]), row(p["bk"]), row(p["bv"]), row(p["bo"]),
         row(p["g1"]), row(p["b1"]), row(p["bi"]), row(p["bd"]),
         row(p["g2"]), row(p["b2"])], axis=0)                    # (10, W) f32

    return dict(
        wq=p["wq"].T.astype(bf16),       # (H, H)
        wk=p["wk"].T.astype(bf16),       # (H, H/3)  -- no 3x replication
        wv=p["wv"].T.astype(bf16),       # (H, H/3)
        wo=p["wo"].T.astype(bf16),       # (H, H)    -- plain, not per-head
        wi=p["wi"].T.astype(bf16),       # (H, I)
        wd=p["wd"].T.astype(bf16),       # (I, H)
        vecs=vec_slab,
    )


# --------------------------------- wrapper ------------------------------------
def bert_layer_forward(hidden_states, attention_mask, packed, num_heads,
                       ln_eps=1e-12, q_tile=256,
                       vmem_limit_bytes=48 * 1024 * 1024):
    """hidden_states: (B, S, H) ; attention_mask: (B, 1, 1, S) additive."""
    B, S, H = hidden_states.shape
    d = H // num_heads
    H3 = packed["wk"].shape[1]
    I = packed["wi"].shape[1]
    W = packed["vecs"].shape[1]

    # Query tile: 256 matches the 256x256 MXU on v6e/v7x (use q_tile=128 on v5e).
    tq = q_tile if (S > q_tile and S % q_tile == 0) else S
    n_qt = S // tq

    mask = attention_mask.reshape(B, 1, S).astype(jnp.float32)
    x = hidden_states.astype(jnp.bfloat16)

    def _w(shape):                  # weight spec: same block every grid step
        zeros = (0,) * len(shape)
        return pl.BlockSpec(shape, lambda b, qi: zeros)

    in_specs = [
        pl.BlockSpec((1, tq, H), lambda b, qi: (b, qi, 0)),   # query rows
        pl.BlockSpec((1, S, H), lambda b, qi: (b, 0, 0)),     # full seq for K/V
        pl.BlockSpec((1, 1, S), lambda b, qi: (b, 0, 0)),     # additive mask
        _w((H, H)),                                           # wq
        _w((H, H3)),                                          # wk
        _w((H, H3)),                                          # wv
        _w((H, H)),                                           # wo
        _w((H, I)),                                           # wi
        _w((I, H)),                                           # wd
        _w((10, W)),                                          # bias/LN slab
    ]

    kernel = functools.partial(_bert_layer_kernel, num_heads=num_heads,
                               head_dim=d, hidden_size=H, kv_size=H3,
                               inter_size=I, ln_eps=ln_eps)

    return pl.pallas_call(
        kernel,
        out_shape=jax.ShapeDtypeStruct((B, S, H), jnp.bfloat16),
        grid_spec=pltpu.PrefetchScalarGridSpec(
            num_scalar_prefetch=0,
            grid=(B, n_qt),
            in_specs=in_specs,
            out_specs=pl.BlockSpec((1, tq, H), lambda b, qi: (b, qi, 0)),
        ),
        compiler_params=pltpu.CompilerParams(
            dimension_semantics=("parallel", "parallel"),
            vmem_limit_bytes=vmem_limit_bytes),
    )(x, x, mask,
      packed["wq"], packed["wk"], packed["wv"], packed["wo"],
      packed["wi"], packed["wd"], packed["vecs"])


# ------------------------------- reference ------------------------------------
def _reference(hidden, attention_mask, p, num_heads, ln_eps=1e-12):
    """Pure-JAX f32 mirror of BertLayer.forward (eval mode, gelu_new)."""
    B, S, H = hidden.shape
    d = H // num_heads
    q = hidden @ p["wq"].T + p["bq"]
    k = hidden @ p["wk"].T + p["bk"]
    v = hidden @ p["wv"].T + p["bv"]
    k = jnp.concatenate([k, k, k], axis=-1)
    v = jnp.concatenate([v, v, v], axis=-1)

    def split(t):
        return t.reshape(B, S, num_heads, d).transpose(0, 2, 1, 3)

    qh, kh, vh = split(q), split(k), split(v)
    scores = jnp.einsum("bnqd,bnkd->bnqk", qh, kh) / math.sqrt(d)
    scores = scores + attention_mask                   # (B,1,1,S) broadcast
    probs = jax.nn.softmax(scores, axis=-1)
    ctx = jnp.einsum("bnqk,bnkd->bnqd", probs, vh)
    ctx = ctx.transpose(0, 2, 1, 3).reshape(B, S, H)

    def ln(x, g, b):
        mu = x.mean(-1, keepdims=True)
        var = ((x - mu) ** 2).mean(-1, keepdims=True)
        return (x - mu) / jnp.sqrt(var + ln_eps) * g + b

    attn = ctx @ p["wo"].T + p["bo"]
    x1 = ln(attn + hidden, p["g1"], p["b1"])
    inter = x1 @ p["wi"].T + p["bi"]
    inter = 0.5 * inter * (1.0 + jnp.tanh(math.sqrt(2.0 / math.pi)
                                          * (inter + 0.044715 * inter ** 3)))
    out = inter @ p["wd"].T + p["bd"]
    return ln(out + x1, p["g2"], p["b2"])


# ----------------------------------- main -------------------------------------
if __name__ == "__main__":
    # config: hidden_size=48 (multiple of 3), num_attention_heads=2 -> head_dim=24
    B, S, H, NH = 2, 8, 48, 2
    I = 4 * H  # intermediate_size = 192

    key = jax.random.PRNGKey(0)
    ks = jax.random.split(key, 19)

    hidden = jax.random.normal(ks[0], (B, S, H), dtype=jnp.float32)
    keep = (jax.random.uniform(ks[1], (B, 1, 1, S)) > 0.2).astype(jnp.float32)
    mask = (1.0 - keep) * -10000.0                      # additive attention mask

    def w(k, shape, s=0.05):
        return s * jax.random.normal(k, shape, dtype=jnp.float32)

    params = {
        "wq": w(ks[2], (H, H)),        "bq": w(ks[3], (H,)),
        "wk": w(ks[4], (H // 3, H)),   "bk": w(ks[5], (H // 3,)),
        "wv": w(ks[6], (H // 3, H)),   "bv": w(ks[7], (H // 3,)),
        "wo": w(ks[8], (H, H)),        "bo": w(ks[9], (H,)),
        "g1": 1.0 + w(ks[10], (H,)),   "b1": w(ks[11], (H,)),
        "wi": w(ks[12], (I, H)),       "bi": w(ks[13], (I,)),
        "wd": w(ks[14], (H, I)),       "bd": w(ks[15], (H,)),
        "g2": 1.0 + w(ks[16], (H,)),   "b2": w(ks[17], (H,)),
    }

    packed = pack_bert_layer_params(params)   # one-time (model load)
    out = bert_layer_forward(hidden, mask, packed, NH)
    out = jax.block_until_ready(out)

    ref = _reference(hidden, mask, params, NH)
    assert out.shape == (B, S, H), out.shape
    err = float(jnp.max(jnp.abs(out.astype(jnp.float32) - ref)))
    # bf16 activations/weights/output with f32 accumulation + approx reciprocal
    # -> loosened tolerance vs the f32 reference.
    assert err < 5e-2, f"max abs error {err}"
    print("KERNEL_OK")
</pallas_src>

<mosaic_0001>
module attributes {stable_mosaic.version = 11 : i64} {
  func.func @_bert_layer_kernel(%arg0: i32, %arg1: i32, %arg2: memref<1x8x48xbf16, #tpu.memory_space<vmem>>, %arg3: memref<1x8x48xbf16, #tpu.memory_space<vmem>>, %arg4: memref<1x1x8xf32, #tpu.memory_space<vmem>>, %arg5: memref<48x48xbf16, #tpu.memory_space<vmem>>, %arg6: memref<48x16xbf16, #tpu.memory_space<vmem>>, %arg7: memref<48x16xbf16, #tpu.memory_space<vmem>>, %arg8: memref<48x48xbf16, #tpu.memory_space<vmem>>, %arg9: memref<48x192xbf16, #tpu.memory_space<vmem>>, %arg10: memref<192x48xbf16, #tpu.memory_space<vmem>>, %arg11: memref<10x192xf32, #tpu.memory_space<vmem>>, %arg12: memref<1x8x48xbf16, #tpu.memory_space<vmem>>) attributes {dimension_semantics = [#tpu.dimension_semantics<parallel>, #tpu.dimension_semantics<parallel>], iteration_bounds = array<i64: 2, 1>, scalar_prefetch = 0 : i64, scratch_operands = 0 : i64, tpu.core_type = #tpu.core_type<tc>, window_params = [{transform_indices = @transform_0, window_bounds = array<i64: 1, 8, 48>}, {transform_indices = @transform_1, window_bounds = array<i64: 1, 8, 48>}, {transform_indices = @transform_2, window_bounds = array<i64: 1, 1, 8>}, {pipeline_mode = #tpu.pipeline_mode<synchronous>, transform_indices = @transform_3, window_bounds = array<i64: 48, 48>}, {pipeline_mode = #tpu.pipeline_mode<synchronous>, transform_indices = @transform_4, window_bounds = array<i64: 48, 16>}, {pipeline_mode = #tpu.pipeline_mode<synchronous>, transform_indices = @transform_5, window_bounds = array<i64: 48, 16>}, {pipeline_mode = #tpu.pipeline_mode<synchronous>, transform_indices = @transform_6, window_bounds = array<i64: 48, 48>}, {pipeline_mode = #tpu.pipeline_mode<synchronous>, transform_indices = @transform_7, window_bounds = array<i64: 48, 192>}, {pipeline_mode = #tpu.pipeline_mode<synchronous>, transform_indices = @transform_8, window_bounds = array<i64: 192, 48>}, {pipeline_mode = #tpu.pipeline_mode<synchronous>, transform_indices = @transform_9, window_bounds = array<i64: 10, 192>}, {transform_indices = @transform_10, window_bounds = array<i64: 1, 8, 48>}]} {
    %c0 = arith.constant 0 : index
    %c0_0 = arith.constant 0 : index
    %c0_1 = arith.constant 0 : index
    %0 = vector.load %arg2[%c0, %c0_0, %c0_1] : memref<1x8x48xbf16, #tpu.memory_space<vmem>>, vector<1x8x48xbf16>
    %1 = vector.shape_cast %0 : vector<1x8x48xbf16> to vector<8x48xbf16>
    %c0_2 = arith.constant 0 : index
    %c0_3 = arith.constant 0 : index
    %c0_4 = arith.constant 0 : index
    %2 = vector.load %arg3[%c0_2, %c0_3, %c0_4] : memref<1x8x48xbf16, #tpu.memory_space<vmem>>, vector<1x8x48xbf16>
    %3 = vector.shape_cast %2 : vector<1x8x48xbf16> to vector<8x48xbf16>
    %c0_5 = arith.constant 0 : index
    %c0_6 = arith.constant 0 : index
    %c0_7 = arith.constant 0 : index
    %4 = vector.load %arg4[%c0_5, %c0_6, %c0_7] : memref<1x1x8xf32, #tpu.memory_space<vmem>>, vector<1x1x8xf32>
    %5 = vector.shape_cast %4 : vector<1x1x8xf32> to vector<1x8xf32>
    %6 = arith.extf %1 : vector<8x48xbf16> to vector<8x48xf32>
    %c0_8 = arith.constant 0 : index
    %c0_9 = arith.constant 0 : index
    %7 = vector.load %arg11[%c0_8, %c0_9] : memref<10x192xf32, #tpu.memory_space<vmem>>, vector<10x192xf32>
    %8 = vector.extract_strided_slice %7 {offsets = [0, 0], sizes = [1, 48], strides = [1, 1]} : vector<10x192xf32> to vector<1x48xf32>
    %9 = vector.extract_strided_slice %7 {offsets = [1, 0], sizes = [1, 16], strides = [1, 1]} : vector<10x192xf32> to vector<1x16xf32>
    %10 = vector.extract_strided_slice %7 {offsets = [2, 0], sizes = [1, 16], strides = [1, 1]} : vector<10x192xf32> to vector<1x16xf32>
    %11 = vector.extract_strided_slice %7 {offsets = [3, 0], sizes = [1, 48], strides = [1, 1]} : vector<10x192xf32> to vector<1x48xf32>
    %12 = vector.extract_strided_slice %7 {offsets = [4, 0], sizes = [1, 48], strides = [1, 1]} : vector<10x192xf32> to vector<1x48xf32>
    %13 = vector.extract_strided_slice %7 {offsets = [5, 0], sizes = [1, 48], strides = [1, 1]} : vector<10x192xf32> to vector<1x48xf32>
    %14 = vector.extract_strided_slice %7 {offsets = [6, 0], sizes = [1, 192], strides = [1, 1]} : vector<10x192xf32> to vector<1x192xf32>
    %15 = vector.extract_strided_slice %7 {offsets = [7, 0], sizes = [1, 48], strides = [1, 1]} : vector<10x192xf32> to vector<1x48xf32>
    %16 = vector.extract_strided_slice %7 {offsets = [8, 0], sizes = [1, 48], strides = [1, 1]} : vector<10x192xf32> to vector<1x48xf32>
    %17 = vector.extract_strided_slice %7 {offsets = [9, 0], sizes = [1, 48], strides = [1, 1]} : vector<10x192xf32> to vector<1x48xf32>
    %c0_10 = arith.constant 0 : index
    %c0_11 = arith.constant 0 : index
    %18 = vector.load %arg5[%c0_10, %c0_11] : memref<48x48xbf16, #tpu.memory_space<vmem>>, vector<48x48xbf16>
    %cst = arith.constant dense<0.000000e+00> : vector<8x48xf32>
    %19 = tpu.matmul %1, %18, %cst {dimension_numbers = #tpu.dot_dimension_numbers<[1], [0], [0], [1], [0, 0, 1, 1], [], []>} : vector<8x48xbf16>, vector<48x48xbf16>, vector<8x48xf32> -> vector<8x48xf32>
    %20 = vector.broadcast %8 : vector<1x48xf32> to vector<8x48xf32>
    %21 = arith.addf %19, %20 : vector<8x48xf32>
    %22 = arith.truncf %21 : vector<8x48xf32> to vector<8x48xbf16>
    %c0_12 = arith.constant 0 : index
    %c0_13 = arith.constant 0 : index
    %23 = vector.load %arg6[%c0_12, %c0_13] : memref<48x16xbf16, #tpu.memory_space<vmem>>, vector<48x16xbf16>
    %cst_14 = arith.constant dense<0.000000e+00> : vector<8x16xf32>
    %24 = tpu.matmul %3, %23, %cst_14 {dimension_numbers = #tpu.dot_dimension_numbers<[1], [0], [0], [1], [0, 0, 1, 1], [], []>} : vector<8x48xbf16>, vector<48x16xbf16>, vector<8x16xf32> -> vector<8x16xf32>
    %25 = vector.broadcast %9 : vector<1x16xf32> to vector<8x16xf32>
    %26 = arith.addf %24, %25 : vector<8x16xf32>
    %c0_15 = arith.constant 0 : index
    %c0_16 = arith.constant 0 : index
    %27 = vector.load %arg7[%c0_15, %c0_16] : memref<48x16xbf16, #tpu.memory_space<vmem>>, vector<48x16xbf16>
    %cst_17 = arith.constant dense<0.000000e+00> : vector<8x16xf32>
    %28 = tpu.matmul %3, %27, %cst_17 {dimension_numbers = #tpu.dot_dimension_numbers<[1], [0], [0], [1], [0, 0, 1, 1], [], []>} : vector<8x48xbf16>, vector<48x16xbf16>, vector<8x16xf32> -> vector<8x16xf32>
    %29 = vector.broadcast %10 : vector<1x16xf32> to vector<8x16xf32>
    %30 = arith.addf %28, %29 : vector<8x16xf32>
    %31 = tpu.concatenate %26, %26, %26 in 1 : vector<8x16xf32>, vector<8x16xf32>, vector<8x16xf32> -> vector<8x48xf32>
    %32 = arith.truncf %31 : vector<8x48xf32> to vector<8x48xbf16>
    %33 = tpu.concatenate %30, %30, %30 in 1 : vector<8x16xf32>, vector<8x16xf32>, vector<8x16xf32> -> vector<8x48xf32>
    %34 = arith.truncf %33 : vector<8x48xf32> to vector<8x48xbf16>
    %35 = vector.extract_strided_slice %22 {offsets = [0, 0], sizes = [8, 24], strides = [1, 1]} : vector<8x48xbf16> to vector<8x24xbf16>
    %36 = vector.extract_strided_slice %32 {offsets = [0, 0], sizes = [8, 24], strides = [1, 1]} : vector<8x48xbf16> to vector<8x24xbf16>
    %cst_18 = arith.constant dense<0.000000e+00> : vector<8x8xf32>
    %37 = tpu.matmul %35, %36, %cst_18 {dimension_numbers = #tpu.dot_dimension_numbers<[1], [1], [0], [0], [0, 0, 1, 0], [], []>} : vector<8x24xbf16>, vector<8x24xbf16>, vector<8x8xf32> -> vector<8x8xf32>
    %cst_19 = arith.constant 0.204124153 : f32
    %38 = vector.broadcast %cst_19 : f32 to vector<8x8xf32>
    %39 = arith.mulf %37, %38 : vector<8x8xf32>
    %40 = vector.broadcast %5 : vector<1x8xf32> to vector<8x8xf32>
    %41 = arith.addf %39, %40 : vector<8x8xf32>
    %cst_20 = arith.constant dense<0xFF800000> : vector<8xf32>
    %42 = vector.multi_reduction <maximumf>, %41, %cst_20 [1] : vector<8x8xf32> to vector<8xf32>
    %43 = vector.shape_cast %42 : vector<8xf32> to vector<8x1xf32>
    %44 = vector.broadcast %43 : vector<8x1xf32> to vector<8x8xf32>
    %45 = arith.subf %41, %44 : vector<8x8xf32>
    %46 = math.exp %45 : vector<8x8xf32>
    %cst_21 = arith.constant dense<0.000000e+00> : vector<8xf32>
    %47 = vector.multi_reduction <add>, %46, %cst_21 [1] : vector<8x8xf32> to vector<8xf32>
    %48 = vector.shape_cast %47 : vector<8xf32> to vector<8x1xf32>
    %49 = tpu.reciprocal %48 {approx = true} : vector<8x1xf32> -> vector<8x1xf32>
    %50 = vector.broadcast %49 : vector<8x1xf32> to vector<8x8xf32>
    %51 = arith.mulf %46, %50 : vector<8x8xf32>
    %52 = arith.truncf %51 : vector<8x8xf32> to vector<8x8xbf16>
    %53 = vector.extract_strided_slice %34 {offsets = [0, 0], sizes = [8, 24], strides = [1, 1]} : vector<8x48xbf16> to vector<8x24xbf16>
    %cst_22 = arith.constant dense<0.000000e+00> : vector<8x24xf32>
    %54 = tpu.matmul %52, %53, %cst_22 {dimension_numbers = #tpu.dot_dimension_numbers<[1], [0], [0], [1], [0, 0, 1, 1], [], []>} : vector<8x8xbf16>, vector<8x24xbf16>, vector<8x24xf32> -> vector<8x24xf32>
    %55 = vector.extract_strided_slice %22 {offsets = [0, 24], sizes = [8, 24], strides = [1, 1]} : vector<8x48xbf16> to vector<8x24xbf16>
    %56 = vector.extract_strided_slice %32 {offsets = [0, 24], sizes = [8, 24], strides = [1, 1]} : vector<8x48xbf16> to vector<8x24xbf16>
    %cst_23 = arith.constant dense<0.000000e+00> : vector<8x8xf32>
    %57 = tpu.matmul %55, %56, %cst_23 {dimension_numbers = #tpu.dot_dimension_numbers<[1], [1], [0], [0], [0, 0, 1, 0], [], []>} : vector<8x24xbf16>, vector<8x24xbf16>, vector<8x8xf32> -> vector<8x8xf32>
    %cst_24 = arith.constant 0.204124153 : f32
    %58 = vector.broadcast %cst_24 : f32 to vector<8x8xf32>
    %59 = arith.mulf %57, %58 : vector<8x8xf32>
    %60 = vector.broadcast %5 : vector<1x8xf32> to vector<8x8xf32>
    %61 = arith.addf %59, %60 : vector<8x8xf32>
    %cst_25 = arith.constant dense<0xFF800000> : vector<8xf32>
    %62 = vector.multi_reduction <maximumf>, %61, %cst_25 [1] : vector<8x8xf32> to vector<8xf32>
    %63 = vector.shape_cast %62 : vector<8xf32> to vector<8x1xf32>
    %64 = vector.broadcast %63 : vector<8x1xf32> to vector<8x8xf32>
    %65 = arith.subf %61, %64 : vector<8x8xf32>
    %66 = math.exp %65 : vector<8x8xf32>
    %cst_26 = arith.constant dense<0.000000e+00> : vector<8xf32>
    %67 = vector.multi_reduction <add>, %66, %cst_26 [1] : vector<8x8xf32> to vector<8xf32>
    %68 = vector.shape_cast %67 : vector<8xf32> to vector<8x1xf32>
    %69 = tpu.reciprocal %68 {approx = true} : vector<8x1xf32> -> vector<8x1xf32>
    %70 = vector.broadcast %69 : vector<8x1xf32> to vector<8x8xf32>
    %71 = arith.mulf %66, %70 : vector<8x8xf32>
    %72 = arith.truncf %71 : vector<8x8xf32> to vector<8x8xbf16>
    %73 = vector.extract_strided_slice %34 {offsets = [0, 24], sizes = [8, 24], strides = [1, 1]} : vector<8x48xbf16> to vector<8x24xbf16>
    %cst_27 = arith.constant dense<0.000000e+00> : vector<8x24xf32>
    %74 = tpu.matmul %72, %73, %cst_27 {dimension_numbers = #tpu.dot_dimension_numbers<[1], [0], [0], [1], [0, 0, 1, 1], [], []>} : vector<8x8xbf16>, vector<8x24xbf16>, vector<8x24xf32> -> vector<8x24xf32>
    %75 = tpu.concatenate %54, %74 in 1 : vector<8x24xf32>, vector<8x24xf32> -> vector<8x48xf32>
    %76 = arith.truncf %75 : vector<8x48xf32> to vector<8x48xbf16>
    %c0_28 = arith.constant 0 : index
    %c0_29 = arith.constant 0 : index
    %77 = vector.load %arg8[%c0_28, %c0_29] : memref<48x48xbf16, #tpu.memory_space<vmem>>, vector<48x48xbf16>
    %cst_30 = arith.constant dense<0.000000e+00> : vector<8x48xf32>
    %78 = tpu.matmul %76, %77, %cst_30 {dimension_numbers = #tpu.dot_dimension_numbers<[1], [0], [0], [1], [0, 0, 1, 1], [], []>} : vector<8x48xbf16>, vector<48x48xbf16>, vector<8x48xf32> -> vector<8x48xf32>
    %79 = vector.broadcast %11 : vector<1x48xf32> to vector<8x48xf32>
    %80 = arith.addf %78, %79 : vector<8x48xf32>
    %81 = arith.addf %80, %6 : vector<8x48xf32>
    %cst_31 = arith.constant dense<0.000000e+00> : vector<8xf32>
    %82 = vector.multi_reduction <add>, %81, %cst_31 [1] : vector<8x48xf32> to vector<8xf32>
    %83 = vector.shape_cast %82 : vector<8xf32> to vector<8x1xf32>
    %cst_32 = arith.constant 4.800000e+01 : f32
    %84 = vector.broadcast %cst_32 : f32 to vector<8x1xf32>
    %85 = arith.divf %83, %84 : vector<8x1xf32>
    %86 = vector.broadcast %85 : vector<8x1xf32> to vector<8x48xf32>
    %87 = arith.subf %81, %86 : vector<8x48xf32>
    %88 = arith.mulf %87, %87 : vector<8x48xf32>
    %cst_33 = arith.constant dense<0.000000e+00> : vector<8xf32>
    %89 = vector.multi_reduction <add>, %88, %cst_33 [1] : vector<8x48xf32> to vector<8xf32>
    %90 = vector.shape_cast %89 : vector<8xf32> to vector<8x1xf32>
    %cst_34 = arith.constant 4.800000e+01 : f32
    %91 = vector.broadcast %cst_34 : f32 to vector<8x1xf32>
    %92 = arith.divf %90, %91 : vector<8x1xf32>
    %cst_35 = arith.constant 9.99999996E-13 : f32
    %93 = vector.broadcast %cst_35 : f32 to vector<8x1xf32>
    %94 = arith.addf %92, %93 : vector<8x1xf32>
    %95 = math.rsqrt %94 : vector<8x1xf32>
    %96 = vector.broadcast %95 : vector<8x1xf32> to vector<8x48xf32>
    %97 = arith.mulf %87, %96 : vector<8x48xf32>
    %98 = vector.broadcast %12 : vector<1x48xf32> to vector<8x48xf32>
    %99 = arith.mulf %97, %98 : vector<8x48xf32>
    %100 = vector.broadcast %13 : vector<1x48xf32> to vector<8x48xf32>
    %101 = arith.addf %99, %100 : vector<8x48xf32>
    %102 = arith.truncf %101 : vector<8x48xf32> to vector<8x48xbf16>
    %c0_36 = arith.constant 0 : index
    %c0_37 = arith.constant 0 : index
    %103 = vector.load %arg9[%c0_36, %c0_37] : memref<48x192xbf16, #tpu.memory_space<vmem>>, vector<48x192xbf16>
    %cst_38 = arith.constant dense<0.000000e+00> : vector<8x192xf32>
    %104 = tpu.matmul %102, %103, %cst_38 {dimension_numbers = #tpu.dot_dimension_numbers<[1], [0], [0], [1], [0, 0, 1, 1], [], []>} : vector<8x48xbf16>, vector<48x192xbf16>, vector<8x192xf32> -> vector<8x192xf32>
    %105 = vector.broadcast %14 : vector<1x192xf32> to vector<8x192xf32>
    %106 = arith.addf %104, %105 : vector<8x192xf32>
    %cst_39 = arith.constant 5.000000e-01 : f32
    %107 = vector.broadcast %cst_39 : f32 to vector<8x192xf32>
    %108 = arith.mulf %107, %106 : vector<8x192xf32>
    %cst_40 = arith.constant 4.471500e-02 : f32
    %109 = vector.broadcast %cst_40 : f32 to vector<8x192xf32>
    %110 = arith.mulf %109, %106 : vector<8x192xf32>
    %111 = arith.mulf %110, %106 : vector<8x192xf32>
    %112 = arith.mulf %111, %106 : vector<8x192xf32>
    %113 = arith.addf %106, %112 : vector<8x192xf32>
    %cst_41 = arith.constant 0.797884583 : f32
    %114 = vector.broadcast %cst_41 : f32 to vector<8x192xf32>
    %115 = arith.mulf %114, %113 : vector<8x192xf32>
    %116 = math.tanh %115 : vector<8x192xf32>
    %cst_42 = arith.constant 1.000000e+00 : f32
    %117 = vector.broadcast %cst_42 : f32 to vector<8x192xf32>
    %118 = arith.addf %117, %116 : vector<8x192xf32>
    %119 = arith.mulf %108, %118 : vector<8x192xf32>
    %120 = arith.truncf %119 : vector<8x192xf32> to vector<8x192xbf16>
    %c0_43 = arith.constant 0 : index
    %c0_44 = arith.constant 0 : index
    %121 = vector.load %arg10[%c0_43, %c0_44] : memref<192x48xbf16, #tpu.memory_space<vmem>>, vector<192x48xbf16>
    %cst_45 = arith.constant dense<0.000000e+00> : vector<8x48xf32>
    %122 = tpu.matmul %120, %121, %cst_45 {dimension_numbers = #tpu.dot_dimension_numbers<[1], [0], [0], [1], [0, 0, 1, 1], [], []>} : vector<8x192xbf16>, vector<192x48xbf16>, vector<8x48xf32> -> vector<8x48xf32>
    %123 = vector.broadcast %15 : vector<1x48xf32> to vector<8x48xf32>
    %124 = arith.addf %122, %123 : vector<8x48xf32>
    %125 = arith.addf %124, %101 : vector<8x48xf32>
    %cst_46 = arith.constant dense<0.000000e+00> : vector<8xf32>
    %126 = vector.multi_reduction <add>, %125, %cst_46 [1] : vector<8x48xf32> to vector<8xf32>
    %127 = vector.shape_cast %126 : vector<8xf32> to vector<8x1xf32>
    %cst_47 = arith.constant 4.800000e+01 : f32
    %128 = vector.broadcast %cst_47 : f32 to vector<8x1xf32>
    %129 = arith.divf %127, %128 : vector<8x1xf32>
    %130 = vector.broadcast %129 : vector<8x1xf32> to vector<8x48xf32>
    %131 = arith.subf %125, %130 : vector<8x48xf32>
    %132 = arith.mulf %131, %131 : vector<8x48xf32>
    %cst_48 = arith.constant dense<0.000000e+00> : vector<8xf32>
    %133 = vector.multi_reduction <add>, %132, %cst_48 [1] : vector<8x48xf32> to vector<8xf32>
    %134 = vector.shape_cast %133 : vector<8xf32> to vector<8x1xf32>
    %cst_49 = arith.constant 4.800000e+01 : f32
    %135 = vector.broadcast %cst_49 : f32 to vector<8x1xf32>
    %136 = arith.divf %134, %135 : vector<8x1xf32>
    %cst_50 = arith.constant 9.99999996E-13 : f32
    %137 = vector.broadcast %cst_50 : f32 to vector<8x1xf32>
    %138 = arith.addf %136, %137 : vector<8x1xf32>
    %139 = math.rsqrt %138 : vector<8x1xf32>
    %140 = vector.broadcast %139 : vector<8x1xf32> to vector<8x48xf32>
    %141 = arith.mulf %131, %140 : vector<8x48xf32>
    %142 = vector.broadcast %16 : vector<1x48xf32> to vector<8x48xf32>
    %143 = arith.mulf %141, %142 : vector<8x48xf32>
    %144 = vector.broadcast %17 : vector<1x48xf32> to vector<8x48xf32>
    %145 = arith.addf %143, %144 : vector<8x48xf32>
    %146 = arith.truncf %145 : vector<8x48xf32> to vector<8x48xbf16>
    %c0_51 = arith.constant 0 : index
    %c0_52 = arith.constant 0 : index
    %c0_53 = arith.constant 0 : index
    %147 = vector.load %arg12[%c0_51, %c0_52, %c0_53] : memref<1x8x48xbf16, #tpu.memory_space<vmem>>, vector<1x8x48xbf16>
    %148 = vector.shape_cast %147 : vector<1x8x48xbf16> to vector<8x48xbf16>
    %149 = vector.shape_cast %146 : vector<8x48xbf16> to vector<1x8x48xbf16>
    tpu.vector_store %arg12[%c0_51, %c0_52, %c0_53], %149 {strides = array<i32>} : memref<1x8x48xbf16, #tpu.memory_space<vmem>>, vector<1x8x48xbf16>,
    return
  }
  func.func @transform_0(%arg0: i32, %arg1: i32) -> (i32, i32, i32) {
    %c0_i32 = arith.constant 0 : i32
    %c0_i32_0 = arith.constant 0 : i32
    return %arg0, %arg1, %c0_i32 : i32, i32, i32
  }
  func.func @transform_1(%arg0: i32, %arg1: i32) -> (i32, i32, i32) {
    %c0_i32 = arith.constant 0 : i32
    %c0_i32_0 = arith.constant 0 : i32
    %c0_i32_1 = arith.constant 0 : i32
    return %arg0, %c0_i32, %c0_i32_0 : i32, i32, i32
  }
  func.func @transform_2(%arg0: i32, %arg1: i32) -> (i32, i32, i32) {
    %c0_i32 = arith.constant 0 : i32
    %c0_i32_0 = arith.constant 0 : i32
    %c0_i32_1 = arith.constant 0 : i32
    return %arg0, %c0_i32, %c0_i32_0 : i32, i32, i32
  }
  func.func @transform_3(%arg0: i32, %arg1: i32) -> (i32, i32) {
    %c0_i32 = arith.constant 0 : i32
    %c0_i32_0 = arith.constant 0 : i32
    %c0_i32_1 = arith.constant 0 : i32
    return %c0_i32, %c0_i32_0 : i32, i32
  }
  func.func @transform_4(%arg0: i32, %arg1: i32) -> (i32, i32) {
    %c0_i32 = arith.constant 0 : i32
    %c0_i32_0 = arith.constant 0 : i32
    %c0_i32_1 = arith.constant 0 : i32
    return %c0_i32, %c0_i32_0 : i32, i32
  }
  func.func @transform_5(%arg0: i32, %arg1: i32) -> (i32, i32) {
    %c0_i32 = arith.constant 0 : i32
    %c0_i32_0 = arith.constant 0 : i32
    %c0_i32_1 = arith.constant 0 : i32
    return %c0_i32, %c0_i32_0 : i32, i32
  }
  func.func @transform_6(%arg0: i32, %arg1: i32) -> (i32, i32) {
    %c0_i32 = arith.constant 0 : i32
    %c0_i32_0 = arith.constant 0 : i32
    %c0_i32_1 = arith.constant 0 : i32
    return %c0_i32, %c0_i32_0 : i32, i32
  }
  func.func @transform_7(%arg0: i32, %arg1: i32) -> (i32, i32) {
    %c0_i32 = arith.constant 0 : i32
    %c0_i32_0 = arith.constant 0 : i32
    %c0_i32_1 = arith.constant 0 : i32
    return %c0_i32, %c0_i32_0 : i32, i32
  }
  func.func @transform_8(%arg0: i32, %arg1: i32) -> (i32, i32) {
    %c0_i32 = arith.constant 0 : i32
    %c0_i32_0 = arith.constant 0 : i32
    %c0_i32_1 = arith.constant 0 : i32
    return %c0_i32, %c0_i32_0 : i32, i32
  }
  func.func @transform_9(%arg0: i32, %arg1: i32) -> (i32, i32) {
    %c0_i32 = arith.constant 0 : i32
    %c0_i32_0 = arith.constant 0 : i32
    %c0_i32_1 = arith.constant 0 : i32
    return %c0_i32, %c0_i32_0 : i32, i32
  }
  func.func @transform_10(%arg0: i32, %arg1: i32) -> (i32, i32, i32) {
    %c0_i32 = arith.constant 0 : i32
    %c0_i32_0 = arith.constant 0 : i32
    return %arg0, %arg1, %c0_i32 : i32, i32, i32
  }
}

</mosaic_0001>

<bundles_post_ra>
// kernel: tpu_custom_call.1
= control target key start
LH: loop header
LB: loop body
LE: loop exit
PB: predicated region body
PF: predicated region fallthrough
CT: control target
= control target key end

     0   :  { %15 = vsyncpa [#allocation3], 0  ;;  %s1798_s0 = inlined_call_operand.vmem [shape: bf16[2,8,48], index: 0, kind: input, shape index: {}]   ;;  %s1799_s1 = inlined_call_operand.vmem [shape: bf16[2,8,48], index: 1, kind: input, shape index: {}]   ;;  %s1800_s2 = inlined_call_operand.vmem [shape: f32[2,1,8], index: 2, kind: input, shape index: {}]   ;;  %s1801_s3 = inlined_call_operand.vmem [shape: bf16[48,48], index: 3, kind: input, shape index: {}]   ;;  %s1802_s4 = inlined_call_operand.vmem [shape: bf16[48,16], index: 4, kind: input, shape index: {}]   ;;  %s1803_s5 = inlined_call_operand.vmem [shape: bf16[48,16], index: 5, kind: input, shape index: {}]   ;;  %s1804_s6 = inlined_call_operand.vmem [shape: bf16[48,48], index: 6, kind: input, shape index: {}]   ;;  %s1805_s7 = inlined_call_operand.vmem [shape: bf16[48,192], index: 7, kind: input, shape index: {}]   ;;  %s1806_s8 = inlined_call_operand.vmem [shape: bf16[192,48], index: 8, kind: input, shape index: {}]   ;;  %s1807_s9 = inlined_call_operand.vmem [shape: f32[10,192], index: 9, kind: input, shape index: {}]   ;;  %s1808_s10 = inlined_call_operand.hbm [shape: bf16[2,8,48], index: 10, kind: output, shape index: {}]  }
   0x1   :  { %17 = vsyncpa [#allocation3 + $0x1], 0  ;;  %s1515_s13 = smov 0   ;;  %s1517_s14 = smov 0  }
   0x2   :  { %s1519_s15 = smov 0   ;;  %s1521_s16 = smov 0  }
   0x3   :  { %s1523_s17 = smov 0   ;;  %s1525_s18 = smov 0  }
   0x4 LB: > { %1811 = sst [smem:[#allocation5_spill]] %s1449_s17  ;;  %s1123_s19 = sadd.s32 4294967295, %s1453_s18   ;;  %s1453_s18 = sphi %s1525_s18, %s23_s18   ;;  %s1449_s17 = sphi %s1523_s17, %s1816_s17   ;;  %s1445_s16 = sphi %s1521_s16, %s1815_s16   ;;  %s1441_s15 = sphi %s1519_s15, %s1819_s15   ;;  %s1437_s14 = sphi %s1517_s14, %s1818_s14   ;;  %s1433_s13 = sphi %s1515_s13, %s1817_s13  }
   0x5   : > { %s1124_s20 = sadd.s32 4294967294, %s1453_s18   ;;  %s35_s21 = sadd.s32 1, %s1449_s17 }
   0x6   : > { %s271_s22 = sadd.s32 1, %s1441_s15  ;;  %p37_p0 = scmp.ge.s32.totalorder %s35_s21, 2 }
   0x7   : > { %p281_p1 = scmp.ne.s32.totalorder %s1441_s15, %s1437_s14  ;;  %p282_p2 = scmp.eq.s32.totalorder %s1123_s19, 1 }
   0x8   : > { %p287_p3 = scmp.ne.s32.totalorder %s1437_s14, %s1433_s13  ;;  %s1821_s21 = smov (%p37_p0, %s35_s21), 0 }
   0x9   : > { %1812 = sst [smem:[#allocation6_spill]] %s1821_s21  ;;  %p1555_p4 = por %p282_p2, %p281_p1 }
   0xa   : > { %p288_p5 = scmp.eq.s32.totalorder %s1124_s20, 1  ;;  %s266_s24 = ssub.s32 %s1449_s17, %s1821_s21 }
   0xb   : > { %p1127_p6 = scmp.ge.s32.totalorder %s1453_s18, 1  ;;  %p269_p7 = scmp.eq.s32.totalorder %s266_s24, 0 }
   0xc   : > { %p1562_p8 = por %p288_p5, %p287_p3  ;;  %p350_p9 = scmp.lt.s32.totalorder %s1453_s18, 3 }
   0xd   : > { %s1568_s26 = scalar_select %p269_p7, %s1441_s15, %s271_s22  }
   0xe   : > { %p351_p10 = pnand %p1127_p6, %p350_p9 }
   0xf   : > { %p397_p11 = scmp.lt.s32.totalorder (!%p351_p10), %s1445_s16, 1  ;;  %s1457_s22 = smov (!%p351_p10), 104  }
  0x10   : > { %354 = sbr.rel (%p351_p10) target bundleno = 1994 (0x7ca), region = 60  ;;  %s1458_s30 = smov (!%p351_p10), 24  }
  0x11   : > { %s394_s27 = sand.u32 (!%p351_p10), 1, %s1437_s14  }
  0x15   : > { %v1271_v0 = vld [vmem:[%s1802_s4 + $0x10] sm:$0xff]  ;;  %v1270_v2 = vld [vmem:[%s1802_s4 + $0x8] sm:$0xff]  ;;  %s1581_s19 = scalar_select %p397_p11, %s1445_s16, 1  ;;  %v1269_v4 = vld [vmem:[%s1802_s4] sm:$0xff]  ;;  %vm444_vm0 = vcmask 392192   ;;  %vm548_vm1 = vcmask 130048  }
  0x16   : > { %v1268_v1 = vld [vmem:[%s1801_s3 + $0x10] sm:$0xff]  ;;  %495 = vmatpush.bf16.msra.mxu1 %v1271_v0  ;;  %v1267_v3 = vld [vmem:[%s1801_s3 + $0x8] sm:$0xff]  ;;  %v1266_v6 = vld [vmem:[%s1801_s3] sm:$0xff]  ;;  %vm550_vm2 = vcmask 261120   ;;  %vm563_vm3 = vcmask 195584   ;;  %vm588_vm4 = vcmask 64512  }
  0x17   : > { %453 = vmatpush.bf16.msra.mxu0 %v1268_v1  ;;  %s1129_s24 = sshll.u32 %s1581_s19, 2  ;;  %v1607_v8 = vld [vmem:[%s1807_s9] sm:$0xff]  ;;  %v1274_v15 = vld [vmem:[%s1803_s5 + $0x10] sm:$0xff]  ;;  %v1273_v16 = vld [vmem:[%s1803_s5 + $0x8] sm:$0xff]  ;;  %vm604_vm5 = vcmask 1043456   ;;  %vm954_vm10 = vcmask 523264  }
  0x18   : > { %s407_s21 = scalar_lea.vmem %s1799_s1, %s1129_s24  ;;  %s403_s17 = scalar_lea.vmem %s1798_s0, %s1129_s24  ;;  %v468_v9 = vperm.slane %v1607_v8, 1  ;;  %533 = vmatpush.bf16.msra.mxu2 %v1274_v15  ;;  %v1272_v17 = vld [vmem:[%s1803_s5] sm:$0xff]  ;;  %v425_v19 = vperm.slane %v1607_v8, 0  ;;  %v509_v31 = vperm.slane %v1607_v8, 2  ;;  %vm1012_vm14 = vcmask 388096  }
  0x19   : > { %v413_v5 = vld [vmem:[%s407_s21] sm:$0xf]  ;;  %s1455_s21 = smov 16   ;;  %s1456_s24 = smov 32  }
  0x1a   : > { %496 = vmatpush.bf16.msra.mxu1 %v1270_v2  ;;  %v1600_v7 = vld [vmem:[%s403_s17] sm:$0xf]  ;;  %s410_s17 = scalar_lea.vmem %s1800_s2, %s1581_s19  ;;  %s1128_s19 = sshll.u32 %s394_s27, 2 }
  0x1b   : > { %454 = vmatpush.bf16.msra.mxu0 %v1267_v3  ;;  %v1356_v38 = vld [vmem:[%s410_s17] ss:$0 sm:$0xff]  ;;  %s396_s11 = scalar_lea.vmem [#allocation2], %s1128_s19  ;;  %s1395_s19 = scalar_lea.hbm %s1808_s10, 8 }
  0x1c   : > { %534 = vmatpush.bf16.msra.mxu2 %v1273_v16  ;;  %s1028_s12 = sshll.u32 %s396_s11, 4  ;;  %s1029_s12 = int_to_ptr.vmem [resolvable:$true] %s1028_s12 }
  0x1e   : > { %497 = vmatpush.bf16.msra.mxu1 %v1269_v4 }
  0x1f   : > { %455 = vmatpush.bf16.msra.mxu0 %v1266_v6 }
  0x20   : > { %535 = vmatpush.bf16.msra.mxu2 %v1272_v17  ;;  %v1277_v17 = vld [vmem:[%s1804_s6 + $0x10] sm:$0xff] }
  0x21   : > { %1156 = vmatmul.msk.bf16.vlgmr.msra.gmra.mxu1 %vm444_vm0, %v413_v5 }
  0x22   : > { %1143 = vmatmul.msk.bf16.vlgmr.msra.gmra.mxu0 %vm444_vm0, %v1600_v7 }
  0x23   : > { %1169 = vmatmul.msk.bf16.vlgmr.msra.gmra.mxu2 %vm444_vm0, %v413_v5 }
  0x24   : > { %727 = vmatpush.bf16.msrb.mxu2 %v1277_v17  ;;  %v1289_v17 = vld [vmem:[%s1806_s8 + $0x28] sm:$0xff] }
  0x9e   : > { %v499_v10 = vpop.f32.mrf.mxu1 }
  0x9f   : > { %v500_v11 = vadd.f32 %v499_v10, %v468_v9  ;;  %v457_v13 = vpop.f32.mrf.mxu0 }
  0xa0   : > { %v458_v22 = vadd.f32 %v457_v13, %v425_v19 }
  0xa1   : > { %542 = vrot.lane.b32.xlu0 %v500_v11, %s1455_s21 }
  0xa2   : > { %v461_v26 = vpack.c.bf16 %v458_v22, %v458_v22 }
  0xa4   : > { %v622_v29 = vunpack.c.l.b16 %v461_v26 }
  0xa6   : > { %v501_v12 = vpop.f32.mrf.mxu1  ;;  %v623_v30 = vpack.c.b16 %v622_v29, %v622_v29  ;;  %v537_v32 = vpop.f32.mrf.mxu2 }
  0xa7   : > { %v459_v14 = vpop.f32.mrf.mxu0  ;;  %v538_v33 = vadd.f32 %v537_v32, %v509_v31  ;;  %v1459_v32 = vmov 48.0  }
  0xa9   : > { %545 = vrot.lane.b32.xlu0 %v500_v11, %s1456_s24 }
  0xae   : > { %v539_v36 = vpop.f32.mrf.mxu2 }
  0xb1   : > { %554 = vrot.lane.b32.xlu0 %v538_v33, %s1455_s21  ;;  %s1263_s21 = sshll.u32 %s1445_s16, 2  ;;  %s1015_s16 = scalar_lea.sflag [#allocation3], %s394_s27 }
 0x113   : > { %v543_v18 = vpop.permute.xlu0 %542 }
 0x114   : > { %v549_v20 = vsel %vm548_vm1, %v500_v11, %v543_v18  ;;  %v1276_v18 = vld [vmem:[%s1804_s6 + $0x8] sm:$0xff] }
 0x115   : > { %728 = vmatpush.bf16.msrb.mxu2 %v1276_v18  ;;  %v1295_v18 = vld [vmem:[%s1806_s8 + $0x58] sm:$0xff] }
 0x11b   : > { %v546_v21 = vpop.permute.xlu0 %545 }
 0x11c   : > { %v551_v23 = vsel %vm550_vm2, %v549_v20, %v546_v21  ;;  %v1275_v21 = vld [vmem:[%s1804_s6] sm:$0xff] }
 0x11d   : > { %v552_v24 = vpack.c.bf16 %v551_v23, %v551_v23  ;;  %729 = vmatpush.bf16.msrb.mxu2 %v1275_v21  ;;  %v1287_v21 = vld [vmem:[%s1806_s8 + $0x18] sm:$0xff] }
 0x11f   : > { %v568_v25 = vsel %vm563_vm3, %v552_v24, 0  ;;  %v627_v27 = vunpack.c.l.b16 %v552_v24 }
 0x120   : > { %577 = vmatpush.bf16.xpose.msra.mxu3 %v568_v25  ;;  %v700_v25 = vperm.slane %v1607_v8, 3 }
 0x121   : > { %v628_v28 = vpack.c.b16 %v627_v27, %v627_v27  ;;  %975 = vmatpush.bf16.msra.mxu2 %v1295_v18 }
 0x123   : > { %629 = vrot.lane.b32.xlu1 %v628_v28, %s1457_s22  ;;  %v555_v44 = vpop.permute.xlu0 %554 }
 0x124   : > { %v560_v46 = vsel %vm548_vm1, %v538_v33, %v555_v44  ;;  %v1283_v44 = vld [vmem:[%s1805_s7 + $0x24] sm:$0xf0] }
 0x127   : > { %1170 = vmatmul.msk.bf16.vlgmr.msra.gmra.mxu3 %vm563_vm3, %v461_v26  ;;  %v415_v26 = vunpack.c.l.bf16 %v1600_v7 }
 0x12b   : > { %624 = vrot.lane.b32.xlu1 %v623_v30, %s1457_s22 }
 0x133   : > { %557 = vrot.lane.b32.xlu1 %v538_v33, %s1456_s24 }
 0x195   : > { %v630_v34 = vpop.permute.xlu1 %629 }
 0x196   : > { %v635_v35 = vsel %vm563_vm3, %v630_v34, 0 }
 0x197   : > { %644 = vmatpush.bf16.xpose.msrb.mxu0 %v635_v35 }
 0x19d   : > { %v625_v37 = vpop.permute.xlu1 %624 }
 0x19e   : > { %1172 = vmatmul.msk.bf16.vlgmr.msrb.gmra.mxu0 %vm563_vm3, %v625_v37 }
 0x1a5   : > { %v558_v45 = vpop.permute.xlu1 %557 }
 0x1a6   : > { %v561_v47 = vsel %vm550_vm2, %v560_v46, %v558_v45  ;;  %v1282_v45 = vld [vmem:[%s1805_s7 + $0x24] sm:$0xf] }
 0x1a7   : > { %v562_v48 = vpack.c.bf16 %v561_v47, %v561_v47  ;;  %v1207_v47 = vld [vmem:[%s1805_s7 + $0x28] sm:$0xf0] }
 0x1a9   : > { %v665_v49 = vunpack.c.l.b16 %v562_v48  ;;  %v606_v50 = vsel %vm604_vm5, %v562_v48, 0  ;;  %v1210_v48 = vor.u32 %v1282_v45, %v1207_v47 }
 0x1aa   : > { %v579_v39 = vpop.f32.mrf.mxu3  ;;  %615 = vmatpush.bf16.msrb.mxu3 %v606_v50  ;;  %v1281_v50 = vld [vmem:[%s1805_s7 + $0x14] sm:$0xf0] }
 0x1ab   : > { %v583_v40 = vmul.f32 0.20412415, %v579_v39  ;;  %v666_v51 = vpack.c.b16 %v665_v49, %v665_v49  ;;  %829 = vmatpush.bf16.msra.mxu0 %v1210_v48  ;;  %v1197_v49 = vld [vmem:[%s1805_s7 + $0x10] sm:$0xf] }
 0x1ad   : > { %v587_v41 = vadd.f32 %v1356_v38, %v583_v40  ;;  %667 = vrot.lane.b32.xlu1 %v666_v51, %s1457_s22  ;;  %v1280_v51 = vld [vmem:[%s1805_s7 + $0x14] sm:$0xf] }
 0x1af   : > { %v589_v42 = vsel %vm588_vm4, %v587_v41, -inf }
 0x1b0   : > { %590 = vmax.xlane.f32.xlu2 %v589_v42 }
 0x1b2   : > { %v581_v43 = vpop.f32.mrf.mxu3 }
 0x1b3   : > { %v1205_v43 = vld [vmem:[%s1805_s7 + $0x20] sm:$0xf] }
 0x1b4   : > { %v1206_v46 = vor.u32 %v1283_v44, %v1205_v43 }
 0x21b   : > { %v646_v52 = vpop.f32.mrf.mxu0 }
 0x21c   : > { %v650_v53 = vmul.f32 0.20412415, %v646_v52  ;;  %v1198_v52 = vor.u32 %v1281_v50, %v1197_v49 }
 0x21e   : > { %v651_v54 = vadd.f32 %v1356_v38, %v650_v53  ;;  %v1199_v53 = vld [vmem:[%s1805_s7 + $0x18] sm:$0xf0] }
 0x21f   : > { %v668_v62 = vpop.permute.xlu1 %667 }
 0x220   : > { %v652_v55 = vsel %vm588_vm4, %v651_v54, -inf  ;;  %v673_v63 = vsel %vm604_vm5, %v668_v62, 0 }
 0x221   : > { %653 = vmax.xlane.f32.xlu2 %v652_v55  ;;  %682 = vmatpush.bf16.msra.mxu3 %v673_v63  ;;  %v1189_v55 = vld [vmem:[%s1805_s7] sm:$0xf] }
 0x223   : > { %v591_v56 = vpop.xlane.xlu2 %590  ;;  %v648_v57 = vpop.f32.mrf.mxu0 }
 0x224   : > { %v592_v58 = vsub.f32 %v587_v41, %v591_v56  ;;  %v1279_v56 = vld [vmem:[%s1805_s7 + $0x4] sm:$0xf0]  ;;  %v1278_v57 = vld [vmem:[%s1805_s7 + $0x4] sm:$0xf] }
 0x226   : > { %v593_v59 = vmul.f32 1.442695, %v592_v58  ;;  %v1190_v58 = vor.u32 %v1279_v56, %v1189_v55  ;;  %v881_v56 = vperm.slane %v1607_v8, 7 }
 0x228   : > { %1357 = vpow2.f32 %v593_v59  ;;  %v1191_v59 = vld [vmem:[%s1805_s7 + $0x8] sm:$0xf0] }
 0x22e   : > { %v1358_v60 = vpop.eup %1357 }
 0x22f   : > { %v595_v61 = vsel %vm588_vm4, %v1358_v60, 0.0 }
 0x230   : > { %596 = vadd.xlane.f32.xlu2 %v595_v61 }
 0x294   : > { %v654_v0 = vpop.xlane.xlu2 %653 }
 0x295   : > { %v655_v1 = vsub.f32 %v651_v54, %v654_v0  ;;  %v1202_v54 = vor.u32 %v1280_v51, %v1199_v53 }
 0x297   : > { %v656_v2 = vmul.f32 1.442695, %v655_v1  ;;  %830 = vmatpush.bf16.msra.mxu0 %v1202_v54 }
 0x299   : > { %1359 = vpow2.f32 %v656_v2 }
 0x29f   : > { %v1360_v3 = vpop.eup %1359 }
 0x2a0   : > { %v658_v4 = vsel %vm588_vm4, %v1360_v3, 0.0 }
 0x2a1   : > { %659 = vadd.xlane.f32.xlu0 %v658_v4 }
 0x2a3   : > { %v597_v5 = vpop.xlane.xlu2 %596 }
 0x2a4   : > { %1361 = vrcp.f32 %v597_v5 }
 0x2aa   : > { %v1362_v6 = vpop.eup %1361 }
 0x2ab   : > { %v599_v9 = vmul.f32 %v1362_v6, %v1358_v60  ;;  %v1194_v60 = vor.u32 %v1278_v57, %v1191_v59  ;;  %v765_v6 = vperm.slane %v1607_v8, 4 }
 0x2ad   : > { %v600_v10 = vpack.c.bf16 %v599_v9, %v599_v9  ;;  %831 = vmatpush.bf16.msra.mxu0 %v1194_v60 }
 0x2af   : > { %1171 = vmatmul.msk.bf16.vlgmr.msrb.gmra.mxu3 %vm588_vm4, %v600_v10  ;;  %v767_v10 = vperm.slane %v1607_v8, 5 }
 0x2b0   : > { %816 = vmatpush.bf16.msrb.mxu3 %v1206_v46 }
 0x2b4   : > { %817 = vmatpush.bf16.msrb.mxu3 %v1198_v52 }
 0x2b8   : > { %818 = vmatpush.bf16.msrb.mxu3 %v1190_v58 }
 0x314   : > { %v660_v11 = vpop.xlane.xlu0 %659 }
 0x315   : > { %1363 = vrcp.f32 %v660_v11 }
 0x316   : > { %1365 = vrcp.f32 %v1459_v32  ;;  %v776_v32 = vperm.slane %v1607_v8, 6 }
 0x31b   : > { %v1364_v12 = vpop.eup %1363 }
 0x31c   : > { %v662_v13 = vmul.f32 %v1364_v12, %v1360_v3  ;;  %v1366_v33 = vpop.eup %1365 }
 0x31d   : > { %v740_v34 = vmul.f32 48.0, %v1366_v33  ;;  %vm744_vm6 = vweird.f32 %v1366_v33 }
 0x31e   : > { %v663_v14 = vpack.c.bf16 %v662_v13, %v662_v13 }
 0x31f   : > { %v741_v35 = vsub.f32 1.0, %v740_v34 }
 0x320   : > { %1173 = vmatmul.msk.bf16.vlgmr.msra.gmra.mxu3 %vm588_vm4, %v663_v14 }
 0x321   : > { %v742_v36 = vmul.f32 %v1366_v33, %v741_v35 }
 0x323   : > { %v743_v37 = vadd.f32 %v1366_v33, %v742_v36 }
 0x325   : > { %v1663_v38 = vsel %vm744_vm6, %v1366_v33, %v743_v37 }
 0x332   : > { %v617_v15 = vpop.f32.mrf.mxu3 }
 0x33a   : > { %v619_v16 = vpop.f32.mrf.mxu3 }
 0x33b   : > { %v1290_v16 = vld [vmem:[%s1806_s8 + $0x30] sm:$0xff] }
 0x3a3   : > { %v684_v19 = vpop.f32.mrf.mxu3 }
 0x3a4   : > { %689 = vrot.lane.b32.xlu2 %v684_v19, %s1458_s30  ;;  %v1288_v19 = vld [vmem:[%s1806_s8 + $0x20] sm:$0xff]  ;;  %s1026_s30 = scalar_lea.hbm %s1808_s10, %s1263_s21 }
 0x3a5   : > { %s1030_s20 = sshll.u32 %s1026_s30, 4  ;;  %s1031_s20 = int_to_ptr.hbm [resolvable:$true] %s1030_s20 }
 0x3a6   : > { %s1389_s22 = sshra.s32 %s1031_s20, 4  ;;  %s1390_s22 = int_to_ptr.hbm [resolvable:$true] %s1389_s22 }
 0x3a7   : > { %s1391_s28 = scalar_lea.hbm %s1390_s22, 4  ;;  %p1396_p1 = scmp.lt.s32.totalorder %s1390_s22, %s1808_s10 }
 0x3a8   : > { %p1392_p12 = scmp.ne.s32.totalorder %s1390_s22, %s1391_s28  ;;  %p1397_p2 = scmp.lt.s32.totalorder %s1395_s19, %s1391_s28 }
 0x3aa   : > { %p1393_p13 = pnand %p1392_p12, %p1555_p4  ;;  %p1398_p3 = por %p1397_p2, %p1396_p1 }
 0x3ab   : > { %v686_v20 = vpop.f32.mrf.mxu3 }
 0x3ac   : > { %v1294_v20 = vld [vmem:[%s1806_s8 + $0x50] sm:$0xff]  ;;  %p1394_p0 = pneg %p1393_p13 }
 0x3ad   : > { %976 = vmatpush.bf16.msra.mxu2 %v1294_v20 }
 0x3ae   : > { %p1399_p5 = pnand %p1398_p3, %p1394_p0 }
 0x3fe   : > { %v690_v22 = vpop.permute.xlu2 %689 }
 0x3ff   : > { %v692_v23 = vsel %vm563_vm3, %v617_v15, %v690_v22  ;;  %v1291_v15 = vld [vmem:[%s1806_s8 + $0x38] sm:$0xff]  ;;  %v1293_v22 = vld [vmem:[%s1806_s8 + $0x48] sm:$0xff] }
 0x400   : > { %v693_v24 = vpack.c.bf16 %v692_v23, %v692_v23  ;;  %958 = vmatpush.bf16.msrb.mxu1 %v1291_v15  ;;  %v1286_v23 = vld [vmem:[%s1806_s8 + $0x10] sm:$0xff]  ;;  %977 = vmatpush.bf16.msra.mxu2 %v1293_v22 }
 0x401   : > { %v418_v15 = vld [vmem:[%s1807_s9 + $0x10] sm:$0x3] }
 0x402   : > { %1186 = vmatmul.msk.bf16.vlgmr.msrb.gmra.mxu2 %vm444_vm0, %v693_v24  ;;  %v1292_v24 = vld [vmem:[%s1806_s8 + $0x40] sm:$0xff] }
 0x404   : > { %959 = vmatpush.bf16.msrb.mxu1 %v1290_v16  ;;  %978 = vmatpush.bf16.msra.mxu2 %v1292_v24 }
 0x408   : > { %960 = vmatpush.bf16.msrb.mxu1 %v1289_v17  ;;  %v1007_v17 = vperm.slane %v418_v15, 0 }
 0x40c   : > { %961 = vmatpush.bf16.msrb.mxu1 %v1288_v19  ;;  %v1009_v19 = vperm.slane %v418_v15, 1 }
 0x410   : > { %962 = vmatpush.bf16.msrb.mxu1 %v1287_v21 }
 0x414   : > { %963 = vmatpush.bf16.msrb.mxu1 %v1286_v23 }
 0x485   : > { %v731_v27 = vpop.f32.mrf.mxu2 }
 0x486   : > { %v732_v28 = vadd.f32 %v731_v27, %v700_v25  ;;  %v1285_v25 = vld [vmem:[%s1806_s8 + $0x8] sm:$0xff]  ;;  %v1284_v27 = vld [vmem:[%s1806_s8] sm:$0xff] }
 0x487   : > { %964 = vmatpush.bf16.msrb.mxu1 %v1285_v25 }
 0x488   : > { %v735_v29 = vadd.f32 %v732_v28, %v415_v26  ;;  %v417_v26 = vld [vmem:[%s1807_s9 + $0x8] sm:$0xff] }
 0x489   : > { %v777_v28 = vperm.slane %v417_v26, 6 }
 0x48a   : > { %v736_v30 = vsel %vm444_vm0, %v735_v29, 0.0 }
 0x48b   : > { %737 = vadd.xlane.f32.xlu1 %v736_v30  ;;  %965 = vmatpush.bf16.msrb.mxu1 %v1284_v27 }
 0x48d   : > { %v733_v31 = vpop.f32.mrf.mxu2 }
 0x4fe   : > { %v738_v39 = vpop.xlane.xlu1 %737 }
 0x4ff   : > { %v746_v7 = vmul.f32 %v1663_v38, %v738_v39 }
 0x501   : > { %v747_v40 = vsub.f32 %v735_v29, %v746_v7 }
 0x503   : > { %v748_v41 = vmul.f32 %v747_v40, %v747_v40 }
 0x505   : > { %v749_v42 = vsel %vm444_vm0, %v748_v41, 0.0 }
 0x506   : > { %750 = vadd.xlane.f32.xlu2 %v749_v42 }
 0x579   : > { %v751_v61 = vpop.xlane.xlu2 %750 }
 0x57a   : > { %v752_v62 = vmul.f32 %v751_v61, %v1663_v38 }
 0x57c   : > { %v753_v63 = vadd.f32 1e-12, %v752_v62 }
 0x57e   : > { %1367 = vrsqrt.f32 %v753_v63  ;;  %vm760_vm8 = vweird.f32 %v753_v63 }
 0x584   : > { %v1368_v0 = vpop.eup %1367 }
 0x585   : > { %v755_v1 = vmul.f32 %v1368_v0, %v753_v63  ;;  %vm761_vm7 = vweird.f32 %v1368_v0 }
 0x586   : > { %vm762_vm9 = vmor %vm760_vm8, %vm761_vm7 }
 0x587   : > { %v756_v2 = vmul.f32 %v1368_v0, %v755_v1 }
 0x589   : > { %v757_v3 = vmul.f32 0.5, %v756_v2 }
 0x58b   : > { %v758_v4 = vsub.f32 1.5, %v757_v3 }
 0x58d   : > { %v759_v5 = vmul.f32 %v1368_v0, %v758_v4 }
 0x58f   : > { %v763_v9 = vsel %vm762_vm9, %v1368_v0, %v759_v5 }
 0x590   : > { %v764_v11 = vmul.f32 %v763_v9, %v747_v40 }
 0x592   : > { %v766_v12 = vmul.f32 %v765_v6, %v764_v11 }
 0x594   : > { %v1706_v13 = vadd.f32 %v767_v10, %v766_v12 }
 0x596   : > { %v769_v14 = vpack.c.bf16 %v1706_v13, %v1706_v13 }
 0x598   : > { %1211 = vmatmul.msk.bf16.vlgmr.msrb.gmra.mxu3 %vm444_vm0, %v769_v14  ;;  %1212 = vmatmul.msk.bf16.vlgmr.msra.gmra.mxu0 %vm444_vm0, %v769_v14 }
 0x615   : > { %v833_v29 = vpop.f32.mrf.mxu0 }
 0x616   : > { %v834_v30 = vadd.f32 %v833_v29, %v777_v28 }
 0x618   : > { %v840_v31 = vmul.f32 0.044715, %v834_v30  ;;  %v838_v47 = vmul.f32 0.5, %v834_v30 }
 0x61a   : > { %v842_v33 = vmul.f32 %v840_v31, %v834_v30 }
 0x61b   : > { %v820_v34 = vpop.f32.mrf.mxu3 }
 0x61c   : > { %v844_v35 = vmul.f32 %v842_v33, %v834_v30  ;;  %v821_v36 = vadd.f32 %v820_v34, %v776_v32 }
 0x61d   : > { %v835_v37 = vpop.f32.mrf.mxu0 }
 0x61e   : > { %v846_v39 = vadd.f32 %v844_v35, %v834_v30  ;;  %v839_v7 = vmul.f32 0.044715, %v821_v36  ;;  %v837_v52 = vmul.f32 0.5, %v821_v36 }
 0x620   : > { %v848_v40 = vmul.f32 0.7978846, %v846_v39  ;;  %v841_v41 = vmul.f32 %v839_v7, %v821_v36 }
 0x622   : > { %1369 = vtanh.f32 %v848_v40  ;;  %v843_v42 = vmul.f32 %v841_v41, %v821_v36 }
 0x623   : > { %v822_v43 = vpop.f32.mrf.mxu3 }
 0x624   : > { %v845_v44 = vadd.f32 %v843_v42, %v821_v36 }
 0x626   : > { %v847_v45 = vmul.f32 0.7978846, %v845_v44 }
 0x628   : > { %v1370_v46 = vpop.eup %1369  ;;  %1371 = vtanh.f32 %v847_v45 }
 0x629   : > { %v852_v48 = vadd.f32 1.0, %v1370_v46 }
 0x62b   : > { %v854_v49 = vmul.f32 %v852_v48, %v838_v47 }
 0x62d   : > { %v856_v50 = vpack.c.bf16 %v854_v49, %v854_v49 }
 0x62e   : > { %v1372_v51 = vpop.eup %1371 }
 0x62f   : > { %1261 = vmatmul.msk.bf16.vlgmr.msra.gmra.mxu2 %vm954_vm10, %v856_v50  ;;  %v851_v53 = vadd.f32 1.0, %v1372_v51 }
 0x631   : > { %v853_v54 = vmul.f32 %v851_v53, %v837_v52 }
 0x633   : > { %v855_v55 = vpack.c.bf16 %v853_v54, %v853_v54 }
 0x635   : > { %966 = vmatmul.bf16.vlgmr.msrb.gmra.mxu1 %v855_v55 }
 0x6b2   : > { %v967_v57 = vpop.f32.mrf.mxu1  ;;  %v980_v58 = vpop.f32.mrf.mxu2 }
 0x6b3   : > { %v968_v59 = vadd.f32 %v967_v57, %v881_v56 }
 0x6b5   : > { %v981_v60 = vadd.f32 %v980_v58, %v968_v59 }
 0x6b7   : > { %v984_v61 = vadd.f32 %v981_v60, %v1706_v13 }
 0x6b9   : > { %v985_v62 = vsel %vm444_vm0, %v984_v61, 0.0 }
 0x6ba   : > { %v969_v63 = vpop.f32.mrf.mxu1  ;;  %v982_v0 = vpop.f32.mrf.mxu2  ;;  %986 = vadd.xlane.f32.xlu0 %v985_v62 }
 0x72d   : > { %v987_v1 = vpop.xlane.xlu0 %986 }
 0x72e   : > { %v988_v2 = vmul.f32 %v987_v1, %v1663_v38 }
 0x730   : > { %v989_v3 = vsub.f32 %v984_v61, %v988_v2 }
 0x732   : > { %v990_v4 = vmul.f32 %v989_v3, %v989_v3 }
 0x734   : > { %v991_v5 = vsel %vm444_vm0, %v990_v4, 0.0 }
 0x735   : > { %992 = vadd.xlane.f32.xlu0 %v991_v5 }
 0x7a8   : > { %v993_v8 = vpop.xlane.xlu0 %992 }
 0x7a9   : > { %v994_v6 = vmul.f32 %v993_v8, %v1663_v38 }
 0x7ab   : > { %v995_v9 = vadd.f32 1e-12, %v994_v6 }
 0x7ad   : > { %1373 = vrsqrt.f32 %v995_v9  ;;  %vm1002_vm12 = vweird.f32 %v995_v9 }
 0x7b3   : > { %v1374_v10 = vpop.eup %1373 }
 0x7b4   : > { %v997_v11 = vmul.f32 %v1374_v10, %v995_v9  ;;  %vm1003_vm11 = vweird.f32 %v1374_v10 }
 0x7b5   : > { %vm1004_vm13 = vmor %vm1002_vm12, %vm1003_vm11 }
 0x7b6   : > { %v998_v12 = vmul.f32 %v1374_v10, %v997_v11 }
 0x7b8   : > { %v999_v13 = vmul.f32 0.5, %v998_v12 }
 0x7ba   : > { %v1000_v14 = vsub.f32 1.5, %v999_v13 }
 0x7bc   : > { %v1001_v16 = vmul.f32 %v1374_v10, %v1000_v14 }
 0x7be   : > { %v1005_v38 = vsel %vm1004_vm13, %v1374_v10, %v1001_v16 }
 0x7bf   : > { %v1006_v18 = vmul.f32 %v1005_v38, %v989_v3 }
 0x7c1   : > { %v1008_v20 = vmul.f32 %v1007_v17, %v1006_v18 }
 0x7c3   : > { %v1010_v21 = vadd.f32 %v1009_v19, %v1008_v20 }
 0x7c5   : > { %v1011_v22 = vpack.c.bf16 %v1010_v21, %v1010_v21 }
 0x7c7   : > { %1013 = vst.msk [vmem:[%s396_s11] sm:$0xf] %vm1012_vm14, %v1011_v22 }
 0x7c8   : > { %1402 = shalt.err (!%p1399_p5)
}
 0x7c9   : > { %1296 = dma.vmem_to_hbm [thread:$0]  (%p1555_p4), %s1029_s12, 64, %s1031_s20, %s1015_s16  }
 0x7ca PF: > { %p1302_p6 = scmp.ge.s32.totalorder %s1453_s18, 2  ;;  %s1042_s27 = sand.u32 1, %s1433_s13  }
 0x7cb   : > { %s1043_s30 = scalar_lea.sflag [#allocation3], %s1042_s27 }
 0x7cc   : > { %p1299_p7 = pnand %p1302_p6, %p1562_p8 }
 0x7ce   : > { %p1300_p9 = pneg %p1299_p7 }
 0x7d0   : > { %1428 = dma.done.wait (%p1300_p9), %s1043_s30, 64  }
 0x7d1   : > { %1430 = vsyncadd (%p1300_p9), %s1043_s30, 4294967232  ;;  %s23_s18 = sadd.s32 1, %s1453_s18   ;;  %s1815_s16 = sld [smem:[#allocation5_spill]] }
 0x7d2   : > { %p20_p10 = scmp.ge.s32.totalorder %s23_s18, 4   ;;  %s1816_s17 = sld [smem:[#allocation6_spill]] }
 0x7d3   : > { %s1817_s13 = smov %s1437_s14  ;;  %s1818_s14 = smov %s1441_s15 }
 0x7d4   : > { %s1819_s15 = smov %s1568_s26  ;;  %22 = sbr.rel (!%p20_p10) target bundleno = 4 (0x4), region = 101 }
 0x7d9   :  { %1049 = vsyncpa [#allocation3], 1 }
 0x7da   :  { %1051 = vsyncpa [#allocation3 + $0x1], 1 }

</bundles_post_ra>
